<compile_context>
chip_gen: v6e
topology: v6e:2x2x1
jax: 0.10.0
libtpu: 0.0.40
codegen_flags: <defaults>
</compile_context>

<pallas_src>
import functools

import jax
import jax.numpy as jnp
from jax.experimental import pallas as pl
from jax.experimental.pallas import tpu as pltpu


# ----------------------------- kernels -----------------------------

def _gat_project_kernel(x_ref, w_ref, a12_ref, wh_ref, f1_ref, f2t_ref, *, nheads):
    """Fused per-row-tile projection.

    Wh_all = x @ W_all (all heads packed into lanes) plus the per-node attention
    scalars f1[i,h] = <Wh_h[i], a1_h>, f2[i,h] = <Wh_h[i], a2_h>, computed as one
    small matmul against a block-diagonal packing of (a1, a2).  The MXU is
    otherwise idle here, so this replaces the per-head VPU reduce + concat chain.
    """
    wh = jnp.dot(x_ref[...], w_ref[...], preferred_element_type=jnp.float32)  # [tq, H*D]
    wh_ref[...] = wh.astype(wh_ref.dtype)          # bf16 store halves the value stream
    f12 = jnp.dot(wh, a12_ref[...], preferred_element_type=jnp.float32)       # [tq, 2H]
    f1_ref[...] = f12[:, :nheads]                  # [tq, H]  query-side scalars
    f2t_ref[...] = f12[:, nheads:].T               # [H, tq]  key-side, lane-dense


def _gat_flash_kernel(occ_ref, f1_ref, f2t_ref, adj_ref, wh_ref, out_ref,
                      m_sc, l_sc, acc_sc, *, nheads, dhead, alpha, apply_elu,
                      score_dtype):
    """Flash-style masked-softmax attention over key tiles with online accumulators.

    grid = (q_tiles, k_tiles).  Per-head state lives in VMEM scratch and is updated
    with in-place slice writes (no concatenates).  Fully-masked key tiles are
    skipped via the prefetched occupancy table.
    """
    qi = pl.program_id(0)
    ki = pl.program_id(1)
    nk = pl.num_programs(1)

    @pl.when(ki == 0)
    def _init():
        m_sc[...] = jnp.full_like(m_sc, -jnp.inf)
        l_sc[...] = jnp.zeros_like(l_sc)
        acc_sc[...] = jnp.zeros_like(acc_sc)

    @pl.when(occ_ref[qi * nk + ki] > 0)            # skip all-masked adjacency tiles
    def _update():
        f1 = f1_ref[...].astype(score_dtype)                   # [tq, H]
        f2t = f2t_ref[...].astype(score_dtype)                 # [H, tk]
        adj_ok = adj_ref[...].astype(jnp.float32) > 0.0        # int8 {0,1} -> mask
        wh = wh_ref[...]                                       # [tk, H*D] values
        neg = jnp.asarray(-9e15, dtype=score_dtype)

        for h in range(nheads):                                # static loop, H small
            hs = slice(h * dhead, (h + 1) * dhead)
            # Score chain in score_dtype (bf16 on v6e/v7x, f32 on v5-class chips).
            e = f1[:, h:h + 1] + f2t[h:h + 1, :]               # [tq, tk]
            e = jnp.where(e > 0, e, alpha * e)                 # LeakyReLU(alpha)
            s = jnp.where(adj_ok, e, neg)                      # adjacency mask (select)

            m_prev = m_sc[:, h:h + 1]                          # [tq, 1] f32
            m_new = jnp.maximum(
                m_prev, jnp.max(s, axis=1, keepdims=True).astype(jnp.float32))
            scale = jnp.exp(m_prev - m_new)                    # [tq, 1] f32
            p = jnp.exp(s - m_new.astype(s.dtype))             # [tq, tk] (EUP)

            # In-place slice updates of the running softmax state (no concats).
            l_sc[:, h:h + 1] = scale * l_sc[:, h:h + 1] + \
                jnp.sum(p.astype(jnp.float32), axis=1, keepdims=True)
            pv = jnp.dot(p.astype(wh.dtype), wh[:, hs],
                         preferred_element_type=jnp.float32)   # [tq, D] f32 acc
            acc_sc[:, hs] = scale * acc_sc[:, hs] + pv
            m_sc[:, h:h + 1] = m_new

    @pl.when(ki == nk - 1)
    def _finalize():
        for h in range(nheads):
            hs = slice(h * dhead, (h + 1) * dhead)
            inv_l = pl.reciprocal(l_sc[:, h:h + 1], approx=False)
            acc_sc[:, hs] = acc_sc[:, hs] * inv_l
        o = acc_sc[...]                                        # [tq, H*D] lane-concat
        if apply_elu:
            o = jnp.where(o > 0.0, o, jnp.exp(o) - 1.0)        # ELU
        out_ref[...] = o.astype(out_ref.dtype)


# ----------------------------- wrappers -----------------------------

def _round_up(n, m):
    return ((n + m - 1) // m) * m


def _pick_tile(padded_n, preferred):
    """Largest tile <= preferred from {preferred, 512, 256, 128} dividing padded_n."""
    for t in [preferred] + [c for c in (512, 256, 128) if c < preferred]:
        if t <= padded_n and padded_n % t == 0:
            return t
    return padded_n          # never hit: padded_n is always a multiple of 128


def _pack_attention_vecs(a1, a2):
    """Block-diagonal [H*D, 2H] packing so wh_all @ A12 = [f1 | f2] in one matmul."""
    H, _ = a1.shape
    eye = jnp.eye(H, dtype=a1.dtype)
    A1 = jnp.einsum('hd,hk->hdk', a1, eye).reshape(-1, H)
    A2 = jnp.einsum('hd,hk->hdk', a2, eye).reshape(-1, H)
    return jnp.concatenate([A1, A2], axis=1)


def _score_dtype_for_device():
    """bf16 score/exp math on chips with bf16 VPU/EUP (v6e/v7x); f32 on v5e & older."""
    try:
        kind = jax.devices()[0].device_kind.lower()
    except Exception:
        kind = ""
    if any(v in kind for v in ("v2", "v3", "v4", "v5")):
        return jnp.float32
    return jnp.bfloat16


def gat_layer(x, adj_mask, occ, W_all, a12, *, nheads, alpha, apply_elu,
              value_dtype, score_dtype, tq, tk):
    """One dense GraphAttentionLayer over all heads; output is [Np, H*D] (lane-concat)."""
    Np, fin = x.shape
    HD = W_all.shape[1]
    H = nheads
    D = HD // H
    nq, nk = Np // tq, Np // tk

    # --- kernel 1: fused projection + per-node attention scalars ---
    wh, f1, f2t = pl.pallas_call(
        functools.partial(_gat_project_kernel, nheads=H),
        out_shape=(jax.ShapeDtypeStruct((Np, HD), value_dtype),
                   jax.ShapeDtypeStruct((Np, H), jnp.float32),
                   jax.ShapeDtypeStruct((H, Np), jnp.float32)),
        grid=(nq,),
        in_specs=[
            pl.BlockSpec((tq, fin), lambda i: (i, 0)),       # x row tile
            pl.BlockSpec((fin, HD), lambda i: (0, 0)),       # packed W (shared)
            pl.BlockSpec((HD, 2 * H), lambda i: (0, 0)),     # packed (a1|a2) (shared)
        ],
        out_specs=(
            pl.BlockSpec((tq, HD), lambda i: (i, 0)),        # Wh_all (value dtype)
            pl.BlockSpec((tq, H), lambda i: (i, 0)),         # f1
            pl.BlockSpec((H, tq), lambda i: (0, i)),         # f2^T
        ),
        compiler_params=pltpu.CompilerParams(dimension_semantics=("parallel",)),
    )(x, W_all, a12)

    # --- kernel 2: flash-style masked softmax attention ---
    grid_spec = pltpu.PrefetchScalarGridSpec(
        num_scalar_prefetch=1,                      # occ table lives in SMEM
        grid=(nq, nk),
        in_specs=[
            pl.BlockSpec((tq, H), lambda qi, ki, *_: (qi, 0)),     # f1 (query rows)
            pl.BlockSpec((H, tk), lambda qi, ki, *_: (0, ki)),     # f2^T (key cols)
            pl.BlockSpec((tq, tk), lambda qi, ki, *_: (qi, ki)),   # int8 adjacency tile
            pl.BlockSpec((tk, HD), lambda qi, ki, *_: (ki, 0)),    # values (key rows)
        ],
        out_specs=pl.BlockSpec((tq, HD), lambda qi, ki, *_: (qi, 0)),
        scratch_shapes=[
            pltpu.VMEM((tq, H), jnp.float32),    # running max  m
            pltpu.VMEM((tq, H), jnp.float32),    # running sum  l
            pltpu.VMEM((tq, HD), jnp.float32),   # running acc  (att @ Wh)
        ],
    )
    out = pl.pallas_call(
        functools.partial(_gat_flash_kernel, nheads=H, dhead=D, alpha=alpha,
                          apply_elu=apply_elu, score_dtype=score_dtype),
        out_shape=jax.ShapeDtypeStruct((Np, HD), jnp.float32),
        grid_spec=grid_spec,
        # q tiles independent -> "parallel" (megacore on v7x); k is the online
        # softmax reduction axis -> "arbitrary".
        compiler_params=pltpu.CompilerParams(
            dimension_semantics=("parallel", "arbitrary")),
    )(occ, f1, f2t, adj_mask, wh)
    return out


def gat_forward(x, adj, params, *, alpha, multilabel=False, precise=False,
                tq=256, tk=256):
    """Two-layer dense GAT forward (eval mode: dropout is identity).

    precise=True keeps all streams/scores in f32 (tight reference checks); the
    default fast path stores Wh in bf16 and uses bf16 score/exp math on v6e/v7x.
    """
    N = x.shape[0]
    H = params["a1"].shape[0]

    if precise:
        value_dtype, score_dtype = jnp.float32, jnp.float32
    else:
        value_dtype, score_dtype = jnp.bfloat16, _score_dtype_for_device()

    # Pad node count up to a tile multiple (instead of one huge full-extent tile).
    # Padded rows get a self-loop so they stay finite; padded columns are masked
    # out for real rows and the padded outputs are sliced off at the end.
    Np = _round_up(max(N, 128), 128)
    tq = _pick_tile(Np, tq)
    tk = _pick_tile(Np, tk)

    mask = (adj > 0).astype(jnp.int8)          # int8 mask: 1/4 of the f32 N^2 stream
    if Np != N:
        pad = Np - N
        mask = jnp.pad(mask, ((0, pad), (0, pad)))
        mask = jnp.maximum(mask, jnp.diag((jnp.arange(Np) >= N).astype(jnp.int8)))
        x = jnp.pad(x, ((0, pad), (0, 0)))

    # Per-(q-tile, k-tile) occupancy table for the scalar-prefetch skip path.
    nq, nk = Np // tq, Np // tk
    occ = (mask.astype(jnp.int32).reshape(nq, tq, nk, tk).sum(axis=(1, 3)) > 0)
    occ = occ.astype(jnp.int32).reshape(-1)

    a12 = _pack_attention_vecs(params["a1"], params["a2"])
    a12_out = _pack_attention_vecs(params["a1_out"], params["a2_out"])

    # TODO(synk): training-mode dropout (RNG) intentionally skipped (eval semantics).
    h = gat_layer(x, mask, occ, params["W_all"], a12, nheads=H, alpha=alpha,
                  apply_elu=True, value_dtype=value_dtype, score_dtype=score_dtype,
                  tq=tq, tk=tk)                                   # [Np, nheads*nhid]
    out = gat_layer(h, mask, occ, params["W_out"], a12_out, nheads=1, alpha=alpha,
                    apply_elu=True, value_dtype=value_dtype, score_dtype=score_dtype,
                    tq=tq, tk=tk)                                 # [Np, nclass]
    out = out[:N]
    if multilabel:
        out = jax.nn.sigmoid(out)
    return out


# ----------------------- pure-JAX reference (for checking) -----------------------

def _ref_layer(h, adj, W, a, alpha, apply_elu):
    F_out = W.shape[1]
    Wh = h @ W
    e = (Wh @ a[:F_out]) + (Wh @ a[F_out:]).T
    e = jnp.where(e > 0, e, alpha * e)
    att = jnp.where(adj > 0, e, -9e15)
    att = jax.nn.softmax(att, axis=1)
    hp = att @ Wh
    return jnp.where(hp > 0, hp, jnp.exp(hp) - 1.0) if apply_elu else hp


def _ref_gat(x, adj, W_heads, a_heads, W_out, a_out, alpha):
    heads = [_ref_layer(x, adj, W_heads[i], a_heads[i], alpha, True)
             for i in range(W_heads.shape[0])]
    h = jnp.concatenate(heads, axis=1)
    return _ref_layer(h, adj, W_out, a_out, alpha, True)


if __name__ == "__main__":
    nfeat, nhid, nclass, nheads = 16, 8, 4, 4
    alpha = 0.2

    key = jax.random.PRNGKey(0)
    kparam, kcase1, kcase2, kcase3 = jax.random.split(key, 4)

    def uinit(k, shape, scale=0.3):
        return jax.random.uniform(k, shape, jnp.float32, -scale, scale)

    k1, k2, k3, k4 = jax.random.split(kparam, 4)
    W_heads = uinit(k1, (nheads, nfeat, nhid))           # [H, F_in, D]
    a_heads = uinit(k2, (nheads, 2 * nhid, 1))           # [H, 2D, 1]
    W_out_t = uinit(k3, (nhid * nheads, nclass))         # [H*D, nclass]
    a_out_t = uinit(k4, (2 * nclass, 1))                 # [2*nclass, 1]

    params = dict(
        # heads packed into the lane dimension: W_all[:, h*D:(h+1)*D] == W_heads[h]
        W_all=jnp.transpose(W_heads, (1, 0, 2)).reshape(nfeat, nheads * nhid),
        a1=a_heads[:, :nhid, 0],                         # [H, D]
        a2=a_heads[:, nhid:, 0],                         # [H, D]
        W_out=W_out_t,                                   # [H*D, nclass] (single "head")
        a1_out=a_out_t[:nclass, :].T,                    # [1, nclass]
        a2_out=a_out_t[nclass:, :].T,                    # [1, nclass]
    )

    def make_graph(k, n, density=0.1):
        kx, ka = jax.random.split(k)
        xg = jax.random.normal(kx, (n, nfeat), dtype=jnp.float32)
        ag = (jax.random.uniform(ka, (n, n)) < density).astype(jnp.float32)
        ag = jnp.maximum(ag, jnp.eye(n, dtype=jnp.float32))   # self-loops
        # TODO(synk): zero-degree rows (no self-loop, no neighbours) would deviate
        # from the torch reference (uniform softmax row); self-loops avoid it.
        return xg, ag

    def check(xg, ag, *, precise, tol_max, tol_mean=None, **kw):
        out = jax.block_until_ready(
            gat_forward(xg, ag, params, alpha=alpha, precise=precise, **kw))
        ref = _ref_gat(xg, ag, W_heads, a_heads, W_out_t, a_out_t, alpha)
        assert out.shape == ref.shape
        diff = jnp.abs(out - ref)
        err_max = float(jnp.max(diff))
        err_mean = float(jnp.mean(diff))
        assert err_max < tol_max, f"precise={precise}: max|err|={err_max:.3e} > {tol_max}"
        if tol_mean is not None:
            assert err_mean < tol_mean, \
                f"precise={precise}: mean|err|={err_mean:.3e} > {tol_mean}"

    # 1) f32 path, N=300 (not a multiple of 128) -> pads to 384, 3x3 grid of 128 tiles.
    x1, adj1 = make_graph(kcase1, 300)
    check(x1, adj1, precise=True, tol_max=2e-4)

    # 2) f32 path, block-diagonal graph at 128 tiles -> exercises the occupancy-skip.
    kb_x, kb_a = jax.random.split(kcase2)
    xb = jax.random.normal(kb_x, (256, nfeat), dtype=jnp.float32)
    blk = (jax.random.uniform(kb_a, (128, 128)) < 0.1).astype(jnp.float32)
    adjb = jnp.zeros((256, 256), jnp.float32)
    adjb = adjb.at[:128, :128].set(blk).at[128:, 128:].set(blk)
    adjb = jnp.maximum(adjb, jnp.eye(256, dtype=jnp.float32))
    check(xb, adjb, precise=True, tol_max=2e-4, tq=128, tk=128)

    # 3) fast path (bf16 values, bf16 scores on v6e/v7x), N=512 -> 2x2 grid of 256
    #    tiles (>= 2 q tiles, so the "parallel" axis can shard across v7x cores).
    #    bf16 streams loosen the match vs the f32 reference, as expected.
    x3, adj3 = make_graph(kcase3, 512)
    check(x3, adj3, precise=False, tol_max=1e-1, tol_mean=1e-2)

    print("KERNEL_OK")
</pallas_src>

<mosaic_0001>
module attributes {stable_mosaic.version = 11 : i64} {
  func.func @_gat_project_kernel(%arg0: i32, %arg1: memref<128x16xf32, #tpu.memory_space<vmem>>, %arg2: memref<16x32xf32, #tpu.memory_space<vmem>>, %arg3: memref<32x8xf32, #tpu.memory_space<vmem>>, %arg4: memref<128x32xf32, #tpu.memory_space<vmem>>, %arg5: memref<128x4xf32, #tpu.memory_space<vmem>>, %arg6: memref<4x128xf32, #tpu.memory_space<vmem>>) attributes {dimension_semantics = [#tpu.dimension_semantics<parallel>], iteration_bounds = array<i64: 3>, scalar_prefetch = 0 : i64, scratch_operands = 0 : i64, tpu.core_type = #tpu.core_type<tc>, window_params = [{transform_indices = @transform_0, window_bounds = array<i64: 128, 16>}, {pipeline_mode = #tpu.pipeline_mode<synchronous>, transform_indices = @transform_1, window_bounds = array<i64: 16, 32>}, {pipeline_mode = #tpu.pipeline_mode<synchronous>, transform_indices = @transform_2, window_bounds = array<i64: 32, 8>}, {transform_indices = @transform_3, window_bounds = array<i64: 128, 32>}, {transform_indices = @transform_4, window_bounds = array<i64: 128, 4>}, {transform_indices = @transform_5, window_bounds = array<i64: 4, 128>}]} {
    %c0 = arith.constant 0 : index
    %c0_0 = arith.constant 0 : index
    %0 = vector.load %arg1[%c0, %c0_0] : memref<128x16xf32, #tpu.memory_space<vmem>>, vector<128x16xf32>
    %c0_1 = arith.constant 0 : index
    %c0_2 = arith.constant 0 : index
    %1 = vector.load %arg2[%c0_1, %c0_2] : memref<16x32xf32, #tpu.memory_space<vmem>>, vector<16x32xf32>
    %cst = arith.constant dense<0.000000e+00> : vector<128x32xf32>
    %2 = tpu.matmul %0, %1, %cst {dimension_numbers = #tpu.dot_dimension_numbers<[1], [0], [0], [1], [0, 0, 1, 1], [], []>} : vector<128x16xf32>, vector<16x32xf32>, vector<128x32xf32> -> vector<128x32xf32>
    %c0_3 = arith.constant 0 : index
    %c0_4 = arith.constant 0 : index
    %3 = vector.load %arg4[%c0_3, %c0_4] : memref<128x32xf32, #tpu.memory_space<vmem>>, vector<128x32xf32>
    tpu.vector_store %arg4[%c0_3, %c0_4], %2 {strides = array<i32>} : memref<128x32xf32, #tpu.memory_space<vmem>>, vector<128x32xf32>,
    %c0_5 = arith.constant 0 : index
    %c0_6 = arith.constant 0 : index
    %4 = vector.load %arg3[%c0_5, %c0_6] : memref<32x8xf32, #tpu.memory_space<vmem>>, vector<32x8xf32>
    %cst_7 = arith.constant dense<0.000000e+00> : vector<128x8xf32>
    %5 = tpu.matmul %2, %4, %cst_7 {dimension_numbers = #tpu.dot_dimension_numbers<[1], [0], [0], [1], [0, 0, 1, 1], [], []>} : vector<128x32xf32>, vector<32x8xf32>, vector<128x8xf32> -> vector<128x8xf32>
    %6 = vector.extract_strided_slice %5 {offsets = [0, 0], sizes = [128, 4], strides = [1, 1]} : vector<128x8xf32> to vector<128x4xf32>
    %c0_8 = arith.constant 0 : index
    %c0_9 = arith.constant 0 : index
    %7 = vector.load %arg5[%c0_8, %c0_9] : memref<128x4xf32, #tpu.memory_space<vmem>>, vector<128x4xf32>
    tpu.vector_store %arg5[%c0_8, %c0_9], %6 {strides = array<i32>} : memref<128x4xf32, #tpu.memory_space<vmem>>, vector<128x4xf32>,
    %8 = vector.extract_strided_slice %5 {offsets = [0, 4], sizes = [128, 4], strides = [1, 1]} : vector<128x8xf32> to vector<128x4xf32>
    %9 = tpu.transpose %8, [1, 0] : vector<128x4xf32> -> vector<4x128xf32>
    %c0_10 = arith.constant 0 : index
    %c0_11 = arith.constant 0 : index
    %10 = vector.load %arg6[%c0_10, %c0_11] : memref<4x128xf32, #tpu.memory_space<vmem>>, vector<4x128xf32>
    tpu.vector_store %arg6[%c0_10, %c0_11], %9 {strides = array<i32>} : memref<4x128xf32, #tpu.memory_space<vmem>>, vector<4x128xf32>,
    return
  }
  func.func @transform_0(%arg0: i32) -> (i32, i32) {
    %c0_i32 = arith.constant 0 : i32
    %c0_i32_0 = arith.constant 0 : i32
    return %arg0, %c0_i32 : i32, i32
  }
  func.func @transform_1(%arg0: i32) -> (i32, i32) {
    %c0_i32 = arith.constant 0 : i32
    %c0_i32_0 = arith.constant 0 : i32
    %c0_i32_1 = arith.constant 0 : i32
    return %c0_i32, %c0_i32_0 : i32, i32
  }
  func.func @transform_2(%arg0: i32) -> (i32, i32) {
    %c0_i32 = arith.constant 0 : i32
    %c0_i32_0 = arith.constant 0 : i32
    %c0_i32_1 = arith.constant 0 : i32
    return %c0_i32, %c0_i32_0 : i32, i32
  }
  func.func @transform_3(%arg0: i32) -> (i32, i32) {
    %c0_i32 = arith.constant 0 : i32
    %c0_i32_0 = arith.constant 0 : i32
    return %arg0, %c0_i32 : i32, i32
  }
  func.func @transform_4(%arg0: i32) -> (i32, i32) {
    %c0_i32 = arith.constant 0 : i32
    %c0_i32_0 = arith.constant 0 : i32
    return %arg0, %c0_i32 : i32, i32
  }
  func.func @transform_5(%arg0: i32) -> (i32, i32) {
    %c0_i32 = arith.constant 0 : i32
    %c0_i32_0 = arith.constant 0 : i32
    return %c0_i32, %arg0 : i32, i32
  }
}

</mosaic_0001>

<bundles_post_ra>
// kernel: tpu_custom_call.1
= control target key start
LH: loop header
LB: loop body
LE: loop exit
PB: predicated region body
PF: predicated region fallthrough
CT: control target
= control target key end

     0   :  { %11 = vsyncpa [#allocation3], 0  ;;  %s1467_s0 = inlined_call_operand.vmem [shape: f32[384,16], index: 0, kind: input, shape index: {}]   ;;  %s1468_s1 = inlined_call_operand.vmem [shape: f32[16,32], index: 1, kind: input, shape index: {}]   ;;  %s1469_s2 = inlined_call_operand.vmem [shape: f32[32,8], index: 2, kind: input, shape index: {}]   ;;  %s1470_s3 = inlined_call_operand.vmem [shape: f32[384,32], index: 3, kind: output, shape index: {0}]   ;;  %s1471_s4 = inlined_call_operand.vmem [shape: f32[384,4], index: 4, kind: output, shape index: {1}]   ;;  %s1472_s5 = inlined_call_operand.hbm [shape: f32[4,384], index: 5, kind: output, shape index: {2}]  }
   0x1   :  { %13 = vsyncpa [#allocation3 + $0x1], 0  ;;  %s1212_s18 = smov 0   ;;  %s1214_s19 = smov 0  }
   0x2   :  { %s1216_s20 = smov 0   ;;  %s1218_s21 = smov 0  }
   0x3 LB: > { %s1233_s22 = sadd.s32 4294967295, %s1178_s21   ;;  %s933_s23 = sadd.s32 4294967294, %s1178_s21   ;;  %s1178_s21 = sphi %s1218_s21, %s1478_s21   ;;  %s1174_s20 = sphi %s1216_s20, %s1477_s20   ;;  %s1170_s19 = sphi %s1214_s19, %s1476_s19   ;;  %s1166_s18 = sphi %s1212_s18, %s1475_s18  }
   0x4   : > { %s1237_s24 = sadd.s32 1, %s1178_s21   ;;  %s146_s25 = sadd.s32 1, %s1174_s20 }
   0x5   : > { %s143_s26 = ssub.s32 %s1178_s21, %s1237_s24  ;;  %p156_p0 = scmp.ne.s32.totalorder %s1174_s20, %s1170_s19 }
   0x6   : > { %p144_p1 = scmp.eq.s32.totalorder %s143_s26, 0  ;;  %p157_p2 = scmp.eq.s32.totalorder %s1233_s22, 2 }
   0x7   : > { %p162_p3 = scmp.ne.s32.totalorder %s1170_s19, %s1166_s18  ;;  %p163_p4 = scmp.eq.s32.totalorder %s933_s23, 2 }
   0x8   : > { %s1248_s27 = scalar_select %p144_p1, %s1174_s20, %s146_s25  }
   0x9   : > { %p1250_p5 = por %p157_p2, %p156_p0  ;;  %p1254_p6 = por %p163_p4, %p162_p3 }
   0xa   : > { %p936_p7 = scmp.ge.s32.totalorder %s1178_s21, 1  ;;  %p196_p8 = scmp.lt.s32.totalorder %s1178_s21, 4 }
   0xc   : > { %p197_p9 = pnand %p936_p7, %p196_p8 }
   0xd   : > { %s938_s9 = sshll.u32 (!%p197_p9), %s1233_s22, 4  ;;  %s1180_s12 = smov (!%p197_p9), 124  }
   0xe   : > { %200 = sbr.rel (%p197_p9) target bundleno = 671 (0x29f), region = 32  ;;  %p235_p10 = scmp.lt.s32.totalorder (!%p197_p9), %s938_s9, 47 }
   0xf   : > { %s231_s13 = sand.u32 (!%p197_p9), 1, %s1170_s19   ;;  %s1181_s7 = smov (!%p197_p9), [#allocation2]  }
  0x10   : > { %s803_s30 = scalar_lea.sflag (!%p197_p9), [#allocation3], %s231_s13 }
  0x13   : > { %v269_v0 = vld [vmem:[%s1468_s1 + $0x8] sm:$0xff]  ;;  %v268_v1 = vld [vmem:[%s1468_s1] sm:$0xff]  ;;  %v484_v2 = vld [vmem:[%s1469_s2 + $0x18] sm:$0xff]  ;;  %s1480_s9 = smov (!%p235_p10, %s938_s9), 47  ;;  %vm270_vm0 = vcmask 130048   ;;  %vm464_vm1 = vcmask 261120  }
  0x14   : > { %1018 = vmatprep.subr.mxu0 %v269_v0  ;;  %1046 = vmatprep.subr.mxu1 %v484_v2  ;;  %v483_v3 = vld [vmem:[%s1469_s2 + $0x10] sm:$0xff]  ;;  %s1273_s14 = sshll.u32 %s1480_s9, 3  ;;  %v482_v20 = vld [vmem:[%s1469_s2 + $0x8] sm:$0xff]  ;;  %v481_v21 = vld [vmem:[%s1469_s2] sm:$0xff]  ;;  %vm678_vm2 = vcmask 31744  }
  0x15   : > { %1019 = vmatpush3.msra.mxu0 %v269_v0  ;;  %1047 = vmatpush3.msra.mxu1 %v484_v2  ;;  %s1279_s17 = scalar_lea.vmem %s1467_s0, %s1273_s14  ;;  %s1323_s8 = scalar_lea.vmem %s1470_s3, %s1273_s14 }
  0x16   : > { %1020 = vmatprep.subr.mxu0 %v268_v1  ;;  %1048 = vmatprep.subr.mxu1 %v483_v3  ;;  %v252_v4 = vld [vmem:[%s1279_s17] sm:$0xff]  ;;  %v253_v5 = vld [vmem:[%s1279_s17 + $0x8] sm:$0xff]  ;;  %v254_v6 = vld [vmem:[%s1279_s17 + $0x10] sm:$0xff]  ;;  %s1377_s11 = scalar_lea.vmem %s1471_s4, %s1273_s14  ;;  %s937_s14 = sshll.u32 %s231_s13, 2 }
  0x17   : > { %1021 = vmatpush3.msra.mxu0 %v268_v1  ;;  %1049 = vmatpush3.msra.mxu1 %v483_v3  ;;  %v255_v7 = vld [vmem:[%s1279_s17 + $0x18] sm:$0xff]  ;;  %v256_v8 = vld [vmem:[%s1279_s17 + $0x20] sm:$0xff]  ;;  %v257_v9 = vld [vmem:[%s1279_s17 + $0x28] sm:$0xff]  ;;  %s233_s15 = scalar_lea.vmem [#allocation2], %s937_s14 }
  0x18   : > { %1022 = vmatprep.mubr.msk.f32.mxu0 %vm270_vm0, %v252_v4  ;;  %v258_v10 = vld [vmem:[%s1279_s17 + $0x30] sm:$0xff]  ;;  %v259_v11 = vld [vmem:[%s1279_s17 + $0x38] sm:$0xff]  ;;  %v260_v12 = vld [vmem:[%s1279_s17 + $0x40] sm:$0xff]  ;;  %1050 = vmatprep.subr.mxu1 %v482_v20  ;;  %s824_s16 = sshll.u32 %s233_s15, 4  ;;  %s1429_s16 = int_to_ptr.vmem [resolvable:$true] %s824_s16 }
  0x19   : > { %1023 = vmatmul.mubr.msk.f32.vlgmr.msra.gmra.mxu0 %vm270_vm0, %v253_v5  ;;  %v261_v13 = vld [vmem:[%s1279_s17 + $0x48] sm:$0xff]  ;;  %v262_v14 = vld [vmem:[%s1279_s17 + $0x50] sm:$0xff]  ;;  %v263_v15 = vld [vmem:[%s1279_s17 + $0x58] sm:$0xff]  ;;  %1051 = vmatpush3.msra.mxu1 %v482_v20  ;;  %s1118_s6 = scalar_lea.vmem %s1429_s16, 64 }
  0x1a   : > { %1025 = vmatprep.mubr.msk.f32.mxu0 %vm270_vm0, %v254_v6  ;;  %v264_v16 = vld [vmem:[%s1279_s17 + $0x60] sm:$0xff]  ;;  %v265_v17 = vld [vmem:[%s1279_s17 + $0x68] sm:$0xff]  ;;  %v266_v18 = vld [vmem:[%s1279_s17 + $0x70] sm:$0xff]  ;;  %1052 = vmatprep.subr.mxu1 %v481_v21  ;;  %p1119_p11 = scmp.ne.s32.totalorder %s1429_s16, %s1118_s6 }
  0x1b   : > { %v267_v19 = vld [vmem:[%s1279_s17 + $0x78] sm:$0xff]  ;;  %1053 = vmatpush3.msra.mxu1 %v481_v21  ;;  %s977_s17 = sshll.u32 %s1233_s22, 6 }
  0x1c   : > { %s822_s26 = scalar_lea.hbm %s1472_s5, %s977_s17  ;;  %p1120_p12 = pnand %p1119_p11, %p1250_p5 }
  0x1d   : > { %1026 = vmatmul.mubr.msk.f32.gmra.mxu0 %vm270_vm0, %v255_v7 }
  0x1e   : > { %1028 = vmatprep.mubr.msk.f32.mxu0 %vm270_vm0, %v256_v8  ;;  %p1121_p13 = pneg %p1120_p12 }
  0x21   : > { %1029 = vmatmul.mubr.msk.f32.gmra.mxu0 %vm270_vm0, %v257_v9 }
  0x22   : > { %1031 = vmatprep.mubr.msk.f32.mxu0 %vm270_vm0, %v258_v10 }
  0x25   : > { %1032 = vmatmul.mubr.msk.f32.gmra.mxu0 %vm270_vm0, %v259_v11 }
  0x26   : > { %1034 = vmatprep.mubr.msk.f32.mxu0 %vm270_vm0, %v260_v12 }
  0x29   : > { %1035 = vmatmul.mubr.msk.f32.gmra.mxu0 %vm270_vm0, %v261_v13 }
  0x2a   : > { %1037 = vmatprep.mubr.msk.f32.mxu0 %vm270_vm0, %v262_v14 }
  0x2d   : > { %1038 = vmatmul.mubr.msk.f32.gmra.mxu0 %vm270_vm0, %v263_v15 }
  0x2e   : > { %1040 = vmatprep.mubr.msk.f32.mxu0 %vm270_vm0, %v264_v16 }
  0x31   : > { %1041 = vmatmul.mubr.msk.f32.gmra.mxu0 %vm270_vm0, %v265_v17 }
  0x32   : > { %1043 = vmatprep.mubr.msk.f32.mxu0 %vm270_vm0, %v266_v18 }
  0x35   : > { %1044 = vmatmul.mubr.msk.f32.gmra.mxu0 %vm270_vm0, %v267_v19 }
  0xd9   : > { %v1024_v22 = vpop.f32.mrf.mxu0 }
  0xda   : > { %466 = vst.msk [vmem:[%s1323_s8 + $0x8] sm:$0xff] %vm464_vm1, %v1024_v22 }
  0xdb   : > { %v385_v23 = vpop.f32.mrf.mxu0 }
  0xdc   : > { %465 = vst.msk [vmem:[%s1323_s8] sm:$0xff] %vm464_vm1, %v385_v23  ;;  %1054 = vmatprep.mubr.msk.f32.mxu1 %vm464_vm1, %v385_v23 }
  0xdd   : > { %v1027_v24 = vpop.f32.mrf.mxu0  ;;  %1055 = vmatmul.mubr.msk.f32.vlgmr.msra.gmra.mxu1 %vm464_vm1, %v1024_v22 }
  0xde   : > { %468 = vst.msk [vmem:[%s1323_s8 + $0x18] sm:$0xff] %vm464_vm1, %v1027_v24 }
  0xdf   : > { %v395_v25 = vpop.f32.mrf.mxu0 }
  0xe0   : > { %467 = vst.msk [vmem:[%s1323_s8 + $0x10] sm:$0xff] %vm464_vm1, %v395_v25  ;;  %1057 = vmatprep.mubr.msk.f32.mxu1 %vm464_vm1, %v395_v25 }
  0xe1   : > { %1058 = vmatmul.mubr.msk.f32.gmra.mxu1 %vm464_vm1, %v1027_v24  ;;  %v1030_v26 = vpop.f32.mrf.mxu0 }
  0xe2   : > { %470 = vst.msk [vmem:[%s1323_s8 + $0x28] sm:$0xff] %vm464_vm1, %v1030_v26 }
  0xe3   : > { %v405_v27 = vpop.f32.mrf.mxu0 }
  0xe4   : > { %469 = vst.msk [vmem:[%s1323_s8 + $0x20] sm:$0xff] %vm464_vm1, %v405_v27  ;;  %1060 = vmatprep.mubr.msk.f32.mxu1 %vm464_vm1, %v405_v27 }
  0xe5   : > { %1061 = vmatmul.mubr.msk.f32.gmra.mxu1 %vm464_vm1, %v1030_v26  ;;  %v1033_v28 = vpop.f32.mrf.mxu0 }
  0xe6   : > { %472 = vst.msk [vmem:[%s1323_s8 + $0x38] sm:$0xff] %vm464_vm1, %v1033_v28 }
  0xe7   : > { %v415_v29 = vpop.f32.mrf.mxu0 }
  0xe8   : > { %471 = vst.msk [vmem:[%s1323_s8 + $0x30] sm:$0xff] %vm464_vm1, %v415_v29  ;;  %1063 = vmatprep.mubr.msk.f32.mxu1 %vm464_vm1, %v415_v29 }
  0xe9   : > { %1064 = vmatmul.mubr.msk.f32.gmra.mxu1 %vm464_vm1, %v1033_v28  ;;  %v1036_v30 = vpop.f32.mrf.mxu0 }
  0xea   : > { %474 = vst.msk [vmem:[%s1323_s8 + $0x48] sm:$0xff] %vm464_vm1, %v1036_v30 }
  0xeb   : > { %v425_v31 = vpop.f32.mrf.mxu0 }
  0xec   : > { %473 = vst.msk [vmem:[%s1323_s8 + $0x40] sm:$0xff] %vm464_vm1, %v425_v31  ;;  %1066 = vmatprep.mubr.msk.f32.mxu1 %vm464_vm1, %v425_v31 }
  0xed   : > { %1067 = vmatmul.mubr.msk.f32.gmra.mxu1 %vm464_vm1, %v1036_v30  ;;  %v1039_v32 = vpop.f32.mrf.mxu0 }
  0xee   : > { %476 = vst.msk [vmem:[%s1323_s8 + $0x58] sm:$0xff] %vm464_vm1, %v1039_v32 }
  0xef   : > { %v435_v33 = vpop.f32.mrf.mxu0 }
  0xf0   : > { %475 = vst.msk [vmem:[%s1323_s8 + $0x50] sm:$0xff] %vm464_vm1, %v435_v33  ;;  %1069 = vmatprep.mubr.msk.f32.mxu1 %vm464_vm1, %v435_v33 }
  0xf1   : > { %1070 = vmatmul.mubr.msk.f32.gmra.mxu1 %vm464_vm1, %v1039_v32  ;;  %v1042_v34 = vpop.f32.mrf.mxu0 }
  0xf2   : > { %478 = vst.msk [vmem:[%s1323_s8 + $0x68] sm:$0xff] %vm464_vm1, %v1042_v34 }
  0xf3   : > { %v445_v35 = vpop.f32.mrf.mxu0 }
  0xf4   : > { %477 = vst.msk [vmem:[%s1323_s8 + $0x60] sm:$0xff] %vm464_vm1, %v445_v35  ;;  %1072 = vmatprep.mubr.msk.f32.mxu1 %vm464_vm1, %v445_v35 }
  0xf5   : > { %1073 = vmatmul.mubr.msk.f32.gmra.mxu1 %vm464_vm1, %v1042_v34  ;;  %v1045_v36 = vpop.f32.mrf.mxu0 }
  0xf6   : > { %480 = vst.msk [vmem:[%s1323_s8 + $0x78] sm:$0xff] %vm464_vm1, %v1045_v36 }
  0xf7   : > { %v455_v37 = vpop.f32.mrf.mxu0 }
  0xf8   : > { %479 = vst.msk [vmem:[%s1323_s8 + $0x70] sm:$0xff] %vm464_vm1, %v455_v37  ;;  %1075 = vmatprep.mubr.msk.f32.mxu1 %vm464_vm1, %v455_v37  ;;  %s1122_s8 = sshll.u32 %s1181_s7, 4  ;;  %s1123_s8 = int_to_ptr.vmem [resolvable:$false] %s1122_s8 }
  0xf9   : > { %1076 = vmatmul.mubr.msk.f32.gmra.mxu1 %vm464_vm1, %v1045_v36  ;;  %s1124_s22 = scalar_lea.vmem %s1123_s8, 128  ;;  %p1125_p0 = scmp.lt.s32.totalorder %s1429_s16, %s1123_s8 }
  0xfa   : > { %p1126_p1 = scmp.lt.s32.totalorder %s1124_s22, %s1118_s6 }
  0xfc   : > { %p1127_p2 = por %p1126_p1, %p1125_p0 }
  0xfe   : > { %p1128_p3 = pnand %p1127_p2, %p1121_p13 }
 0x19d   : > { %v1056_v38 = vpop.f32.mrf.mxu1 }
 0x19e   : > { %680 = vst.msk [vmem:[%s1377_s11 + $0x8] sm:$0xff] %vm678_vm2, %v1056_v38  ;;  %713 = vrot.lane.b32.xlu0 %v1056_v38, %s1180_s12 }
 0x19f   : > { %v599_v39 = vpop.f32.mrf.mxu1 }
 0x1a0   : > { %679 = vst.msk [vmem:[%s1377_s11] sm:$0xff] %vm678_vm2, %v599_v39 }
 0x1a1   : > { %v1059_v40 = vpop.f32.mrf.mxu1 }
 0x1a2   : > { %682 = vst.msk [vmem:[%s1377_s11 + $0x18] sm:$0xff] %vm678_vm2, %v1059_v40  ;;  %711 = vrot.lane.b32.xlu0 %v599_v39, %s1180_s12 }
 0x1a3   : > { %v609_v41 = vpop.f32.mrf.mxu1 }
 0x1a4   : > { %681 = vst.msk [vmem:[%s1377_s11 + $0x10] sm:$0xff] %vm678_vm2, %v609_v41  ;;  %715 = vrot.lane.b32.xlu1 %v609_v41, %s1180_s12 }
 0x1a5   : > { %v1062_v42 = vpop.f32.mrf.mxu1 }
 0x1a6   : > { %684 = vst.msk [vmem:[%s1377_s11 + $0x28] sm:$0xff] %vm678_vm2, %v1062_v42 }
 0x1a7   : > { %v619_v43 = vpop.f32.mrf.mxu1 }
 0x1a8   : > { %717 = vrot.lane.b32.xlu1 %v1059_v40, %s1180_s12  ;;  %683 = vst.msk [vmem:[%s1377_s11 + $0x20] sm:$0xff] %vm678_vm2, %v619_v43  ;;  %719 = vrot.lane.b32.xlu0 %v619_v43, %s1180_s12 }
 0x1a9   : > { %v1065_v44 = vpop.f32.mrf.mxu1 }
 0x1aa   : > { %686 = vst.msk [vmem:[%s1377_s11 + $0x38] sm:$0xff] %vm678_vm2, %v1065_v44 }
 0x1ab   : > { %v629_v45 = vpop.f32.mrf.mxu1 }
 0x1ac   : > { %721 = vrot.lane.b32.xlu1 %v1062_v42, %s1180_s12  ;;  %685 = vst.msk [vmem:[%s1377_s11 + $0x30] sm:$0xff] %vm678_vm2, %v629_v45  ;;  %723 = vrot.lane.b32.xlu0 %v629_v45, %s1180_s12 }
 0x1ad   : > { %v1068_v46 = vpop.f32.mrf.mxu1 }
 0x1ae   : > { %688 = vst.msk [vmem:[%s1377_s11 + $0x48] sm:$0xff] %vm678_vm2, %v1068_v46 }
 0x1af   : > { %v639_v47 = vpop.f32.mrf.mxu1 }
 0x1b0   : > { %725 = vrot.lane.b32.xlu1 %v1065_v44, %s1180_s12  ;;  %687 = vst.msk [vmem:[%s1377_s11 + $0x40] sm:$0xff] %vm678_vm2, %v639_v47  ;;  %727 = vrot.lane.b32.xlu0 %v639_v47, %s1180_s12 }
 0x1b1   : > { %v1071_v48 = vpop.f32.mrf.mxu1 }
 0x1b2   : > { %690 = vst.msk [vmem:[%s1377_s11 + $0x58] sm:$0xff] %vm678_vm2, %v1071_v48 }
 0x1b3   : > { %v649_v49 = vpop.f32.mrf.mxu1 }
 0x1b4   : > { %729 = vrot.lane.b32.xlu1 %v1068_v46, %s1180_s12  ;;  %689 = vst.msk [vmem:[%s1377_s11 + $0x50] sm:$0xff] %vm678_vm2, %v649_v49  ;;  %731 = vrot.lane.b32.xlu0 %v649_v49, %s1180_s12 }
 0x1b5   : > { %v1074_v50 = vpop.f32.mrf.mxu1 }
 0x1b6   : > { %692 = vst.msk [vmem:[%s1377_s11 + $0x68] sm:$0xff] %vm678_vm2, %v1074_v50 }
 0x1b7   : > { %v659_v51 = vpop.f32.mrf.mxu1 }
 0x1b8   : > { %733 = vrot.lane.b32.xlu1 %v1071_v48, %s1180_s12  ;;  %691 = vst.msk [vmem:[%s1377_s11 + $0x60] sm:$0xff] %vm678_vm2, %v659_v51  ;;  %735 = vrot.lane.b32.xlu0 %v659_v51, %s1180_s12 }
 0x1b9   : > { %v1077_v52 = vpop.f32.mrf.mxu1 }
 0x1ba   : > { %694 = vst.msk [vmem:[%s1377_s11 + $0x78] sm:$0xff] %vm678_vm2, %v1077_v52 }
 0x1bb   : > { %v669_v53 = vpop.f32.mrf.mxu1 }
 0x1bc   : > { %737 = vrot.lane.b32.xlu1 %v1074_v50, %s1180_s12  ;;  %693 = vst.msk [vmem:[%s1377_s11 + $0x70] sm:$0xff] %vm678_vm2, %v669_v53  ;;  %739 = vrot.lane.b32.xlu0 %v669_v53, %s1180_s12 }
 0x1c0   : > { %741 = vrot.lane.b32.xlu1 %v1077_v52, %s1180_s12 }
 0x210   : > { %v714_v54 = vpop.permute.xlu0 %713 }
 0x214   : > { %v712_v55 = vpop.permute.xlu0 %711 }
 0x215   : > { %759 = vxpose.xlu0.b32.start [1/16] (narrow) %v712_v55, 8 }
 0x216   : > { %v716_v56 = vpop.permute.xlu1 %715 }
 0x219   : > { %760 = vxpose.xlu0.b32.cont [2/16] (narrow) %v714_v54, 8 }
 0x21a   : > { %v718_v57 = vpop.permute.xlu1 %717  ;;  %v720_v58 = vpop.permute.xlu0 %719 }
 0x21d   : > { %761 = vxpose.xlu0.b32.cont [3/16] (narrow) %v716_v56, 8 }
 0x21e   : > { %v722_v59 = vpop.permute.xlu1 %721  ;;  %v724_v60 = vpop.permute.xlu0 %723 }
 0x221   : > { %762 = vxpose.xlu0.b32.cont [4/16] (narrow) %v718_v57, 8 }
 0x222   : > { %v726_v61 = vpop.permute.xlu1 %725  ;;  %v728_v62 = vpop.permute.xlu0 %727 }
 0x225   : > { %763 = vxpose.xlu0.b32.cont [5/16] (narrow) %v720_v58, 8 }
 0x226   : > { %v730_v63 = vpop.permute.xlu1 %729  ;;  %v732_v0 = vpop.permute.xlu0 %731 }
 0x229   : > { %764 = vxpose.xlu0.b32.cont [6/16] (narrow) %v722_v59, 8 }
 0x22a   : > { %v734_v1 = vpop.permute.xlu1 %733  ;;  %v736_v2 = vpop.permute.xlu0 %735 }
 0x22d   : > { %765 = vxpose.xlu0.b32.cont [7/16] (narrow) %v724_v60, 8 }
 0x22e   : > { %v738_v3 = vpop.permute.xlu1 %737  ;;  %v740_v4 = vpop.permute.xlu0 %739 }
 0x231   : > { %766 = vxpose.xlu0.b32.cont [8/16] (narrow) %v726_v61, 8 }
 0x232   : > { %v742_v5 = vpop.permute.xlu1 %741 }
 0x235   : > { %767 = vxpose.xlu0.b32.cont [9/16] (narrow) %v728_v62, 8 }
 0x239   : > { %768 = vxpose.xlu0.b32.cont [10/16] (narrow) %v730_v63, 8 }
 0x23d   : > { %769 = vxpose.xlu0.b32.cont [11/16] (narrow) %v732_v0, 8 }
 0x241   : > { %770 = vxpose.xlu0.b32.cont [12/16] (narrow) %v734_v1, 8 }
 0x245   : > { %771 = vxpose.xlu0.b32.cont [13/16] (narrow) %v736_v2, 8 }
 0x249   : > { %772 = vxpose.xlu0.b32.cont [14/16] (narrow) %v738_v3, 8 }
 0x24d   : > { %773 = vxpose.xlu0.b32.cont [15/16] (narrow) %v740_v4, 8 }
 0x251   : > { %774 = vxpose.xlu0.b32.end [16/16] (narrow) %v742_v5, 8 }
 0x291   : > { %v775_v6 = vpop.trf.xlu0 }
 0x292   : > { %791 = vst [vmem:[%s233_s15] sm:$0xf] %v775_v6 }
 0x293   : > { %1131 = shalt.err (!%p1128_p3)
}
 0x294   : > { %s1132_s9 = scalar_lea.hbm %s822_s26, 64  ;;  %s1136_s12 = scalar_lea.hbm %s1472_s5, 192 }
 0x295   : > { %p1133_p4 = scmp.ne.s32.totalorder %s822_s26, %s1132_s9  ;;  %p1137_p9 = scmp.lt.s32.totalorder %s822_s26, %s1472_s5 }
 0x296   : > { %p1138_p10 = scmp.lt.s32.totalorder %s1136_s12, %s1132_s9 }
 0x297   : > { %p1134_p7 = pnand %p1133_p4, %p1250_p5 }
 0x298   : > { %p1139_p11 = por %p1138_p10, %p1137_p9 }
 0x299   : > { %p1135_p8 = pneg %p1134_p7 }
 0x29b   : > { %p1140_p12 = pnand %p1139_p11, %p1135_p8 }
 0x29d   : > { %1143 = shalt.err (!%p1140_p12)
}
 0x29e   : > { %1078 = dma.vmem_to_hbm [thread:$0]  (%p1250_p5), %s1429_s16, 64, %s822_s26, %s803_s30  }
 0x29f PF: > { %p1084_p13 = scmp.ge.s32.totalorder %s1178_s21, 2  ;;  %s852_s15 = sand.u32 1, %s1166_s18  }
 0x2a0   : > { %s853_s17 = scalar_lea.sflag [#allocation3], %s852_s15 }
 0x2a1   : > { %p1081_p0 = pnand %p1084_p13, %p1254_p6 }
 0x2a3   : > { %p1082_p1 = pneg %p1081_p0 }
 0x2a5   : > { %1161 = dma.done.wait (%p1082_p1), %s853_s17, 64  }
 0x2a6   : > { %1163 = vsyncadd (%p1082_p1), %s853_s17, 4294967232  ;;  %p16_p2 = scmp.ge.s32.totalorder %s1237_s24, 5   ;;  %s1475_s18 = smov %s1170_s19 }
 0x2a7   : > { %s1476_s19 = smov %s1174_s20  ;;  %s1477_s20 = smov %s1248_s27 }
 0x2a8   : > { %s1478_s21 = smov %s1237_s24  ;;  %18 = sbr.rel (!%p16_p2) target bundleno = 3 (0x3), region = 91 }
 0x2ad   :  { %858 = vsyncpa [#allocation3], 1 }
 0x2ae   :  { %860 = vsyncpa [#allocation3 + $0x1], 1 }

</bundles_post_ra>
